<compile_context>
chip_gen: v7x
topology: tpu7x:2x2x1
jax: 0.10.0
libtpu: 0.0.40
codegen_flags: <defaults>
</compile_context>

<pallas_src>
import math

import numpy as np

import jax
import jax.numpy as jnp
from jax.experimental import pallas as pl
from jax.experimental.pallas import tpu as pltpu


# ----------------------------------------------------------------------------
# Hoisted input projection: xproj = x_flat @ W_ih0^T + (b_ih0 + b_hh0)
# One large, fully parallel MXU matmul over all T*B rows.
# ----------------------------------------------------------------------------
def _inproj_kernel(x_ref, w_ref, b_ref, o_ref):
    o_ref[...] = (
        jnp.dot(x_ref[...], w_ref[...], preferred_element_type=jnp.float32)
        + b_ref[...]
    ).astype(o_ref.dtype)


def _input_projection(x2d, w_t, b_row, *, tm_target=256):
    rows, k = x2d.shape
    n = w_t.shape[1]
    # 256-row tiles when the row count allows it (MXU-friendly on v6e/v7x);
    # otherwise fall back to a single full block (small demo shapes).
    tm = tm_target if (rows % tm_target == 0) else rows
    grid = (rows // tm,)
    return pl.pallas_call(
        _inproj_kernel,
        out_shape=jax.ShapeDtypeStruct((rows, n), jnp.float32),
        grid_spec=pltpu.PrefetchScalarGridSpec(
            num_scalar_prefetch=0,
            grid=grid,
            in_specs=[
                pl.BlockSpec((tm, k), lambda m: (m, 0)),
                pl.BlockSpec((k, n), lambda m: (0, 0)),   # weight resident in VMEM
                pl.BlockSpec((1, n), lambda m: (0, 0)),   # fused bias resident
            ],
            out_specs=pl.BlockSpec((tm, n), lambda m: (m, 0)),
        ),
        compiler_params=pltpu.CompilerParams(
            dimension_semantics=("parallel",),
        ),
    )(x2d, w_t, b_row)


# ----------------------------------------------------------------------------
# Recurrent kernel: the whole time loop, grid=(T,) sequential.
# ----------------------------------------------------------------------------
def _make_recurrent_kernel(num_layers: int, hidden: int):
    L = num_layers
    H = hidden

    def kernel(xproj_ref, whh0_ref, wdeep_ref, bdeep_ref, h0_ref, c0_ref,
               y_ref, hT_ref, cT_ref, h_sc, c_sc):
        t = pl.program_id(0)

        @pl.when(t == 0)
        def _init():
            h_sc[...] = h0_ref[...].astype(jnp.float32)
            c_sc[...] = c0_ref[...].astype(jnp.float32)

        # Snapshot previous-timestep state: every layer (including l>0, which
        # consumes h of layer l-1) reads the OLD state, matching the reference.
        h_prev = h_sc[...]        # [L, B, H] f32
        c_prev = c_sc[...]        # [L, B, H] f32

        def lstm_update(gates_f32, c_old):
            # Heaviside surrogate forward: spike = (gate >= 0), kept as bool masks.
            spk = gates_f32 >= 0.0
            i_g = spk[:, 0 * H:1 * H]
            f_g = spk[:, 1 * H:2 * H]
            g_g = spk[:, 2 * H:3 * H]
            o_g = spk[:, 3 * H:4 * H]
            # c' = clamp_max(c*f + i*g, 1.0) with binary gates -> selects, no multiplies.
            c_new = jnp.minimum(
                jnp.where(f_g, c_old, 0.0)
                + jnp.where(jnp.logical_and(i_g, g_g), 1.0, 0.0),
                1.0)
            h_new = jnp.where(o_g, c_new, 0.0)   # h' = c' * o
            return h_new, c_new

        # ---- layer 0: x @ W_ih^T (+ fused bias) was hoisted; only the recurrent matmul here.
        gates0 = xproj_ref[0] + jnp.dot(
            h_prev[0], whh0_ref[...], preferred_element_type=jnp.float32)
        h_new, c_new = lstm_update(gates0, c_prev[0])
        h_sc[0] = h_new
        c_sc[0] = c_new

        # ---- deeper layers: fused resident weight [W_ih^T ; W_hh^T] of shape [2H, 4H].
        for l in range(1, L):
            w_l = wdeep_ref[l - 1]                       # [2H, 4H], VMEM-resident
            gates = (
                jnp.dot(h_prev[l - 1], w_l[:H], preferred_element_type=jnp.float32)
                + jnp.dot(h_prev[l], w_l[H:], preferred_element_type=jnp.float32)
                + bdeep_ref[l - 1]                       # pre-summed b_ih + b_hh
            )
            h_new, c_new = lstm_update(gates, c_prev[l])
            h_sc[l] = h_new
            c_sc[l] = c_new

        # Output of the last layer at this timestep (lane-dense, H % 128 == 0).
        y_ref[0] = h_new.astype(y_ref.dtype)

        # Final states, written once on the last step (resident output blocks).
        @pl.when(t == pl.num_programs(0) - 1)
        def _finalize():
            hT_ref[...] = h_sc[...].astype(hT_ref.dtype)
            cT_ref[...] = c_sc[...].astype(cT_ref.dtype)

    return kernel


def spiking_lstm_forward(x, params, h0, c0):
    """Forward pass of the stacked (non-bidirectional) SpikingLSTM.

    x:      [T, B, input_size]
    params: list of per-layer tuples (w_ih [4H, in], w_hh [4H, H], b_ih [4H], b_hh [4H])
    h0, c0: [L, B, H] initial states
    returns y [T, B, H], h_T [L, B, H], c_T [L, B, H]
    """
    f32 = jnp.float32
    T, B, I = x.shape
    L, _, H = h0.shape

    w_ih0, w_hh0, b_ih0, b_hh0 = params[0]
    w_ih0_t = jnp.asarray(w_ih0, f32).T                       # [I, 4H]
    w_hh0_t = jnp.asarray(w_hh0, f32).T                       # [H, 4H]
    b0 = (jnp.asarray(b_ih0, f32) + jnp.asarray(b_hh0, f32)).reshape(1, 4 * H)

    # Hoisted layer-0 input projection over all timesteps (one big MXU matmul).
    xproj = _input_projection(x.reshape(T * B, I).astype(f32), w_ih0_t, b0)
    xproj = xproj.reshape(T, B, 4 * H)

    if L > 1:
        w_deep = jnp.stack([
            jnp.concatenate([jnp.asarray(params[l][0], f32).T,
                             jnp.asarray(params[l][1], f32).T], axis=0)
            for l in range(1, L)])                            # [L-1, 2H, 4H]
        b_deep = jnp.stack([
            (jnp.asarray(params[l][2], f32)
             + jnp.asarray(params[l][3], f32)).reshape(1, 4 * H)
            for l in range(1, L)])                            # [L-1, 1, 4H]
    else:  # unused dummies so the kernel signature stays fixed
        w_deep = jnp.zeros((1, 2 * H, 4 * H), f32)
        b_deep = jnp.zeros((1, 1, 4 * H), f32)
    nd = max(L - 1, 1)

    kernel = _make_recurrent_kernel(L, H)
    y, h_T, c_T = pl.pallas_call(
        kernel,
        out_shape=(
            jax.ShapeDtypeStruct((T, B, H), f32),
            jax.ShapeDtypeStruct((L, B, H), f32),
            jax.ShapeDtypeStruct((L, B, H), f32),
        ),
        grid_spec=pltpu.PrefetchScalarGridSpec(
            num_scalar_prefetch=0,
            grid=(T,),
            in_specs=[
                pl.BlockSpec((1, B, 4 * H), lambda t: (t, 0, 0)),       # xproj[t]
                pl.BlockSpec((H, 4 * H), lambda t: (0, 0)),             # W_hh0^T resident
                pl.BlockSpec((nd, 2 * H, 4 * H), lambda t: (0, 0, 0)),  # deep fused W resident
                pl.BlockSpec((nd, 1, 4 * H), lambda t: (0, 0, 0)),      # deep fused bias resident
                pl.BlockSpec((L, B, H), lambda t: (0, 0, 0)),           # h0
                pl.BlockSpec((L, B, H), lambda t: (0, 0, 0)),           # c0
            ],
            out_specs=(
                pl.BlockSpec((1, B, H), lambda t: (t, 0, 0)),           # y[t]
                pl.BlockSpec((L, B, H), lambda t: (0, 0, 0)),           # h_T
                pl.BlockSpec((L, B, H), lambda t: (0, 0, 0)),           # c_T
            ),
            scratch_shapes=[
                pltpu.VMEM((L, B, H), f32),   # h state, persists across grid steps
                pltpu.VMEM((L, B, H), f32),   # c state, persists across grid steps
            ],
        ),
        compiler_params=pltpu.CompilerParams(
            dimension_semantics=("arbitrary",),   # time loop is serialized by h->h dependency
        ),
    )(xproj, w_hh0_t, w_deep, b_deep, h0.astype(f32), c0.astype(f32))
    return y, h_T, c_T


# ----------------------------------------------------------------------------
# Pure-JAX reference, mirroring the PyTorch module exactly.
# ----------------------------------------------------------------------------
def spiking_lstm_reference(x, params, h0, c0):
    T, B, _ = x.shape
    L, _, H = h0.shape
    h = h0.astype(jnp.float32)
    c = c0.astype(jnp.float32)
    ys = []
    for t in range(T):
        h_old, c_old = h, c
        new_h, new_c = [], []
        for l in range(L):
            inp = x[t].astype(jnp.float32) if l == 0 else h_old[l - 1]
            w_ih, w_hh, b_ih, b_hh = params[l]
            gates = inp @ w_ih.T + b_ih + h_old[l] @ w_hh.T + b_hh
            spk = (gates >= 0).astype(jnp.float32)
            i_g = spk[:, 0 * H:1 * H]
            f_g = spk[:, 1 * H:2 * H]
            g_g = spk[:, 2 * H:3 * H]
            o_g = spk[:, 3 * H:4 * H]
            c_new = jnp.minimum(c_old[l] * f_g + i_g * g_g, 1.0)
            h_new = c_new * o_g
            new_h.append(h_new)
            new_c.append(c_new)
        h = jnp.stack(new_h)
        c = jnp.stack(new_c)
        ys.append(h[-1])
    return jnp.stack(ys), h, c


if __name__ == "__main__":
    key = jax.random.PRNGKey(0)
    T, B, I, H, L = 6, 4, 64, 128, 2   # hidden multiple of 128 -> lane-aligned gates/outputs

    keys = jax.random.split(key, 1 + 4 * L)
    x = jax.random.normal(keys[0], (T, B, I), jnp.float32)

    bound = 1.0 / math.sqrt(H)
    params = []
    ki = 1
    for l in range(L):
        in_sz = I if l == 0 else H
        w_ih = jax.random.uniform(keys[ki + 0], (4 * H, in_sz), jnp.float32, -bound, bound)
        w_hh = jax.random.uniform(keys[ki + 1], (4 * H, H), jnp.float32, -bound, bound)
        b_ih = jax.random.uniform(keys[ki + 2], (4 * H,), jnp.float32, -bound, bound)
        b_hh = jax.random.uniform(keys[ki + 3], (4 * H,), jnp.float32, -bound, bound)
        params.append((w_ih, w_hh, b_ih, b_hh))
        ki += 4

    h0 = jnp.zeros((L, B, H), jnp.float32)
    c0 = jnp.zeros((L, B, H), jnp.float32)

    y, h_T, c_T = spiking_lstm_forward(x, params, h0, c0)
    jax.block_until_ready((y, h_T, c_T))

    y_ref, h_ref, c_ref = spiking_lstm_reference(x, params, h0, c0)
    np.testing.assert_allclose(np.asarray(y), np.asarray(y_ref), atol=1e-5)
    np.testing.assert_allclose(np.asarray(h_T), np.asarray(h_ref), atol=1e-5)
    np.testing.assert_allclose(np.asarray(c_T), np.asarray(c_ref), atol=1e-5)

    print("KERNEL_OK")
</pallas_src>

<mosaic_0001>
module attributes {stable_mosaic.version = 11 : i64} {
  func.func @_inproj_kernel(%arg0: i32, %arg1: memref<24x64xf32, #tpu.memory_space<vmem>>, %arg2: memref<64x512xf32, #tpu.memory_space<vmem>>, %arg3: memref<1x512xf32, #tpu.memory_space<vmem>>, %arg4: memref<24x512xf32, #tpu.memory_space<vmem>>) attributes {dimension_semantics = [#tpu.dimension_semantics<parallel>], iteration_bounds = array<i64: 1>, scalar_prefetch = 0 : i64, scratch_operands = 0 : i64, tpu.core_type = #tpu.core_type<tc>, window_params = [{transform_indices = @transform_0, window_bounds = array<i64: 24, 64>}, {pipeline_mode = #tpu.pipeline_mode<synchronous>, transform_indices = @transform_1, window_bounds = array<i64: 64, 512>}, {pipeline_mode = #tpu.pipeline_mode<synchronous>, transform_indices = @transform_2, window_bounds = array<i64: 1, 512>}, {transform_indices = @transform_3, window_bounds = array<i64: 24, 512>}]} {
    %c0 = arith.constant 0 : index
    %c0_0 = arith.constant 0 : index
    %0 = vector.load %arg1[%c0, %c0_0] : memref<24x64xf32, #tpu.memory_space<vmem>>, vector<24x64xf32>
    %c0_1 = arith.constant 0 : index
    %c0_2 = arith.constant 0 : index
    %1 = vector.load %arg2[%c0_1, %c0_2] : memref<64x512xf32, #tpu.memory_space<vmem>>, vector<64x512xf32>
    %cst = arith.constant dense<0.000000e+00> : vector<24x512xf32>
    %2 = tpu.matmul %0, %1, %cst {dimension_numbers = #tpu.dot_dimension_numbers<[1], [0], [0], [1], [0, 0, 1, 1], [], []>} : vector<24x64xf32>, vector<64x512xf32>, vector<24x512xf32> -> vector<24x512xf32>
    %c0_3 = arith.constant 0 : index
    %c0_4 = arith.constant 0 : index
    %3 = vector.load %arg3[%c0_3, %c0_4] : memref<1x512xf32, #tpu.memory_space<vmem>>, vector<1x512xf32>
    %4 = vector.broadcast %3 : vector<1x512xf32> to vector<24x512xf32>
    %5 = arith.addf %2, %4 : vector<24x512xf32>
    %c0_5 = arith.constant 0 : index
    %c0_6 = arith.constant 0 : index
    %6 = vector.load %arg4[%c0_5, %c0_6] : memref<24x512xf32, #tpu.memory_space<vmem>>, vector<24x512xf32>
    tpu.vector_store %arg4[%c0_5, %c0_6], %5 {strides = array<i32>} : memref<24x512xf32, #tpu.memory_space<vmem>>, vector<24x512xf32>,
    return
  }
  func.func @transform_0(%arg0: i32) -> (i32, i32) {
    %c0_i32 = arith.constant 0 : i32
    %c0_i32_0 = arith.constant 0 : i32
    return %arg0, %c0_i32 : i32, i32
  }
  func.func @transform_1(%arg0: i32) -> (i32, i32) {
    %c0_i32 = arith.constant 0 : i32
    %c0_i32_0 = arith.constant 0 : i32
    %c0_i32_1 = arith.constant 0 : i32
    return %c0_i32, %c0_i32_0 : i32, i32
  }
  func.func @transform_2(%arg0: i32) -> (i32, i32) {
    %c0_i32 = arith.constant 0 : i32
    %c0_i32_0 = arith.constant 0 : i32
    %c0_i32_1 = arith.constant 0 : i32
    return %c0_i32, %c0_i32_0 : i32, i32
  }
  func.func @transform_3(%arg0: i32) -> (i32, i32) {
    %c0_i32 = arith.constant 0 : i32
    %c0_i32_0 = arith.constant 0 : i32
    return %arg0, %c0_i32 : i32, i32
  }
}

</mosaic_0001>

<bundles_post_ra>
// kernel: tpu_custom_call.1
= control target key start
LH: loop header
LB: loop body
LE: loop exit
PB: predicated region body
PF: predicated region fallthrough
CT: control target
= control target key end

     0   :  { %8 = vsyncpa [#allocation3], 0  ;;  %s503_s0 = inlined_call_operand.hbm [shape: f32[24,64], index: 0, kind: input, shape index: {}]   ;;  %s504_s1 = inlined_call_operand.hbm [shape: f32[64,512], index: 1, kind: input, shape index: {}]   ;;  %s505_s2 = inlined_call_operand.vmem [shape: f32[1,512], index: 2, kind: input, shape index: {}]   ;;  %s506_s3 = inlined_call_operand.hbm [shape: f32[24,512], index: 3, kind: output, shape index: {}]  }
   0x1   :  { %9 = vsyncpa [#allocation6], 0 }
   0x2   :  { %10 = vsyncpa [#allocation4], 0  ;;  %s424_s12 = smov [#allocation2]   ;;  %s352_s16 = scalar_lea.hbm %s503_s0, 384 }
   0x3   :  { %s16_s13 = sshll.u32 %s424_s12, 4  ;;  %p353_p0 = scmp.ne.s32.totalorder %s503_s0, %s352_s16  ;;  %s17_s13 = int_to_ptr.vmem [resolvable:$true] %s16_s13 }
   0x4   :  { %p356_p1 = scmp.lt.u32.totalorder %s352_s16, %s503_s0 }
   0x6   :  { %p358_p2 = pnand %p356_p1, %p353_p0 }
   0x8   :  { %361 = shalt.err (!%p358_p2)
}
   0x9   :  { %s362_s21 = scalar_lea.vmem %s17_s13, 384  ;;  %p367_p4 = scmp.lt.s32.totalorder %s17_s13, %s17_s13 }
   0xa   :  { %p363_p3 = scmp.ne.s32.totalorder %s17_s13, %s362_s21  ;;  %p368_p5 = scmp.lt.s32.totalorder %s362_s21, %s362_s21 }
   0xc   :  { %p369_p6 = por %p368_p5, %p367_p4 }
   0xe   :  { %p370_p7 = pnand %p369_p6, %p363_p3 }
  0x10   :  { %373 = shalt.err (!%p370_p7)
}
  0x11   :  { %s425_s22 = smov 128   ;;  %s426_s23 = smov 8  }
  0x12   :  { %22 = dma.hbm_to_vmem [thread:$0]  %s503_s0, 384, %s17_s13, [#allocation3], %s425_s22, %s425_s22, %s426_s23  }
  0x13   :  { %s427_s26 = smov [#allocation5]   ;;  %s374_s30 = scalar_lea.hbm %s504_s1, 4096 }
  0x14   :  { %s28_s27 = sshll.u32 %s427_s26, 4  ;;  %p375_p8 = scmp.ne.s32.totalorder %s504_s1, %s374_s30  ;;  %s29_s27 = int_to_ptr.vmem [resolvable:$true] %s28_s27 }
  0x15   :  { %p378_p9 = scmp.lt.u32.totalorder %s374_s30, %s504_s1 }
  0x17   :  { %p380_p10 = pnand %p378_p9, %p375_p8 }
  0x19   :  { %383 = shalt.err (!%p380_p10)
}
  0x1a   :  { %s384_s8 = scalar_lea.vmem %s29_s27, 4096  ;;  %p389_p12 = scmp.lt.s32.totalorder %s29_s27, %s29_s27 }
  0x1b   :  { %p385_p11 = scmp.ne.s32.totalorder %s29_s27, %s384_s8  ;;  %p390_p13 = scmp.lt.s32.totalorder %s384_s8, %s384_s8 }
  0x1d   :  { %p391_p0 = por %p390_p13, %p389_p12 }
  0x1f   :  { %p392_p1 = pnand %p391_p0, %p385_p11 }
  0x21   :  { %395 = shalt.err (!%p392_p1)
}
  0x22   :  { %s428_s0 = smov 512   ;;  %s429_s9 = smov 32  }
  0x23   :  { %34 = dma.hbm_to_vmem [thread:$0]  %s504_s1, 4096, %s29_s27, [#allocation6], %s428_s0, %s428_s0, %s429_s9  }
  0x24   :  { %418 = dma.done.wait [#allocation3], 384  }
  0x25   :  { %419 = vsyncadd [#allocation3], 4294966912 }
  0x26   :  { %420 = dma.done.wait [#allocation6], 4096  }
  0x27   :  { %421 = vsyncadd [#allocation6], 4294963200  ;;  %v430_v0 = vmov 0.0   ;;  %v47_v1 = vld [vmem:[#allocation5 + $0x8] sm:$0xff]  ;;  %v49_v3 = vld [vmem:[#allocation5 + $0x18] sm:$0xff]  ;;  %vm100_vm0 = vcmask 523264   ;;  %v80_v52 = vlaneseq }
  0x28   :  { %174 = vmatprep.mubr.f32.mxu0 %v430_v0  ;;  %257 = vmatprep.mubr.f32.mxu1 %v430_v0  ;;  %v51_v2 = vld [vmem:[#allocation5 + $0x28] sm:$0xff]  ;;  %v53_v5 = vld [vmem:[#allocation5 + $0x38] sm:$0xff]  ;;  %v46_v6 = vld [vmem:[#allocation5] sm:$0xff] }
  0x29   :  { %v312_v4 = vpack.c.bf16 %v51_v2, %v47_v1  ;;  %v50_v7 = vld [vmem:[#allocation5 + $0x20] sm:$0xff]  ;;  %v328_v8 = vpack.c.bf16 %v53_v5, %v49_v3  ;;  %v48_v10 = vld [vmem:[#allocation5 + $0x10] sm:$0xff]  ;;  %v55_v12 = vld [vmem:[#allocation5 + $0x48] sm:$0xff]  ;;  %v81_v53 = vshrl.u32 %v80_v52, 7 }
  0x2a   :  { %v314_v9 = vpack.c.bf16 %v50_v7, %v46_v6  ;;  %v52_v11 = vld [vmem:[#allocation5 + $0x30] sm:$0xff]  ;;  %v59_v14 = vld [vmem:[#allocation5 + $0x68] sm:$0xff]  ;;  %v57_v15 = vld [vmem:[#allocation5 + $0x58] sm:$0xff] }
  0x2b   :  { %313 = vmatprep.subr.bf16.mxu0 %v312_v4  ;;  %v330_v13 = vpack.c.bf16 %v52_v11, %v48_v10  ;;  %v61_v16 = vld [vmem:[#allocation5 + $0x78] sm:$0xff]  ;;  %329 = vmatprep.subr.bf16.mxu1 %v328_v8  ;;  %v316_v17 = vpack.c.bf16 %v59_v14, %v55_v12  ;;  %v54_v19 = vld [vmem:[#allocation5 + $0x40] sm:$0xff]  ;;  %v56_v21 = vld [vmem:[#allocation5 + $0x50] sm:$0xff]  ;;  %v82_v54 = vsub.s32 0, %v81_v53  ;;  %v90_v56 = vsub.s32 2, %v81_v53 }
  0x2c   :  { %315 = vmatpush1.bf16.msra.mxu0 %v314_v9  ;;  %v332_v18 = vpack.c.bf16 %v61_v16, %v57_v15  ;;  %v58_v20 = vld [vmem:[#allocation5 + $0x60] sm:$0xff]  ;;  %v60_v23 = vld [vmem:[#allocation5 + $0x70] sm:$0xff]  ;;  %v63_v24 = vld [vmem:[#allocation5 + $0x88] sm:$0xff]  ;;  %v86_v57 = vsub.s32 1, %v81_v53  ;;  %v94_v58 = vsub.s32 3, %v81_v53 }
  0x2d   :  { %331 = vmatpush1.bf16.msra.mxu1 %v330_v13  ;;  %v318_v22 = vpack.c.bf16 %v58_v20, %v54_v19  ;;  %v67_v25 = vld [vmem:[#allocation5 + $0xa8] sm:$0xff]  ;;  %317 = vmatprep.subr.bf16.mxu0 %v316_v17  ;;  %v334_v26 = vpack.c.bf16 %v60_v23, %v56_v21  ;;  %v65_v28 = vld [vmem:[#allocation5 + $0x98] sm:$0xff]  ;;  %v62_v30 = vld [vmem:[#allocation5 + $0x80] sm:$0xff] }
  0x2e   :  { %333 = vmatprep.subr.bf16.mxu1 %v332_v18  ;;  %v320_v27 = vpack.c.bf16 %v67_v25, %v63_v24  ;;  %v69_v29 = vld [vmem:[#allocation5 + $0xb8] sm:$0xff]  ;;  %v66_v32 = vld [vmem:[#allocation5 + $0xa0] sm:$0xff]  ;;  %v64_v33 = vld [vmem:[#allocation5 + $0x90] sm:$0xff] }
  0x2f   :  { %v336_v31 = vpack.c.bf16 %v69_v29, %v65_v28  ;;  %v68_v34 = vld [vmem:[#allocation5 + $0xb0] sm:$0xff]  ;;  %v322_v35 = vpack.c.bf16 %v66_v32, %v62_v30  ;;  %v71_v36 = vld [vmem:[#allocation5 + $0xc8] sm:$0xff]  ;;  %v73_v38 = vld [vmem:[#allocation5 + $0xd8] sm:$0xff] }
  0x30   :  { %319 = vmatpush1.bf16.msra.mxu0 %v318_v22  ;;  %v75_v37 = vld [vmem:[#allocation5 + $0xe8] sm:$0xff]  ;;  %v338_v39 = vpack.c.bf16 %v68_v34, %v64_v33  ;;  %v77_v41 = vld [vmem:[#allocation5 + $0xf8] sm:$0xff]  ;;  %v70_v42 = vld [vmem:[#allocation5 + $0xc0] sm:$0xff] }
  0x31   :  { %335 = vmatpush1.bf16.msra.mxu1 %v334_v26  ;;  %321 = vmatprep.subr.bf16.mxu0 %v320_v27  ;;  %v324_v40 = vpack.c.bf16 %v75_v37, %v71_v36  ;;  %v74_v43 = vld [vmem:[#allocation5 + $0xe0] sm:$0xff]  ;;  %v340_v44 = vpack.c.bf16 %v77_v41, %v73_v38  ;;  %v72_v45 = vld [vmem:[#allocation5 + $0xd0] sm:$0xff]  ;;  %v43_v49 = vld [vmem:[#allocation2] sm:$0xff] }
  0x32   :  { %337 = vmatprep.subr.bf16.mxu1 %v336_v31  ;;  %v76_v46 = vld [vmem:[#allocation5 + $0xf0] sm:$0xff]  ;;  %v326_v47 = vpack.c.bf16 %v74_v43, %v70_v42  ;;  %v45_v51 = vld [vmem:[#allocation2 + $0x10] sm:$0xff]  ;;  %v78_v55 = vld [vmem:[%s505_s2] sm:$0xf]  ;;  %s431_s2 = smov [#allocation7]  }
  0x33   :  { %v342_v48 = vpack.c.bf16 %v76_v46, %v72_v45  ;;  %v44_v50 = vld [vmem:[#allocation2 + $0x8] sm:$0xff]  ;;  %v83_v59 = vrot.slane %v78_v55, %v82_v54  ;;  %v91_v60 = vrot.slane %v78_v55, %v90_v56  ;;  %v87_v61 = vrot.slane %v78_v55, %v86_v57  ;;  %s293_s13 = sshll.u32 %s431_s2, 4  ;;  %s294_s13 = int_to_ptr.vmem [resolvable:$true] %s293_s13 }
  0x34   :  { %323 = vmatpush1.bf16.msra.mxu0 %v322_v35  ;;  %v95_v62 = vrot.slane %v78_v55, %v94_v58  ;;  %s396_s14 = scalar_lea.vmem %s294_s13, 1536  ;;  %p401_p3 = scmp.lt.s32.totalorder %s294_s13, %s294_s13 }
  0x35   :  { %339 = vmatpush1.bf16.msra.mxu1 %v338_v39  ;;  %325 = vmatprep.subr.bf16.mxu0 %v324_v40  ;;  %p397_p2 = scmp.ne.s32.totalorder %s294_s13, %s396_s14  ;;  %p402_p4 = scmp.lt.s32.totalorder %s396_s14, %s396_s14 }
  0x36   :  { %341 = vmatprep.subr.bf16.mxu1 %v340_v44 }
  0x37   :  { %p403_p5 = por %p402_p4, %p401_p3 }
  0x38   :  { %327 = vmatpush1.bf16.msra.mxu0 %v326_v47 }
  0x39   :  { %343 = vmatpush1.bf16.msra.mxu1 %v342_v48  ;;  %p404_p6 = pnand %p403_p5, %p397_p2 }
  0x3b   :  { %306 = vmatmul.mubr.msk.f32.vlgmr.msra.gmra.mrb[0].mxu0 %vm100_vm0, %v43_v49 }
  0x3c   :  { %309 = vmatmul.mubr.msk.f32.vlgmr.msra.gmra.mrb[0].mxu1 %vm100_vm0, %v43_v49  ;;  %180 = vmatprep.mubr.f32.mxu0 %v430_v0 }
  0x3d   :  { %263 = vmatprep.mubr.f32.mxu1 %v430_v0 }
  0x3f   :  { %307 = vmatmul.mubr.msk.f32.gmra.mrb[2].mxu0 %vm100_vm0, %v44_v50 }
  0x40   :  { %310 = vmatmul.mubr.msk.f32.gmra.mrb[2].mxu1 %vm100_vm0, %v44_v50  ;;  %186 = vmatprep.mubr.f32.mxu0 %v430_v0 }
  0x41   :  { %269 = vmatprep.mubr.f32.mxu1 %v430_v0 }
  0x43   :  { %308 = vmatmul.mubr.msk.f32.gmra.mrb[4].mxu0 %vm100_vm0, %v45_v51 }
  0x44   :  { %311 = vmatmul.mubr.msk.f32.gmra.mrb[4].mxu1 %vm100_vm0, %v45_v51 }
 0x10e   :  { %v176_v63 = vpop.f32.mrb[0].mxu0 }
 0x10f   :  { %v177_v1 = vadd.f32 %v176_v63, %v83_v59  ;;  %v259_v2 = vpop.f32.mrb[0].mxu1  ;;  %v178_v0 = vpop.f32.mrb[1].mxu0 }
 0x110   :  { %v260_v3 = vadd.f32 %v259_v2, %v91_v60  ;;  %v179_v4 = vadd.f32 %v178_v0, %v87_v61  ;;  %v261_v5 = vpop.f32.mrb[1].mxu1 }
 0x111   :  { %276 = vst [vmem:[#allocation7] sm:$0xff] %v177_v1  ;;  %v262_v6 = vadd.f32 %v261_v5, %v95_v62 }
 0x112   :  { %278 = vst [vmem:[#allocation7 + $0x10] sm:$0xff] %v260_v3  ;;  %277 = vst [vmem:[#allocation7 + $0x8] sm:$0xff] %v179_v4  ;;  %v182_v7 = vpop.f32.mrb[2].mxu0 }
 0x113   :  { %279 = vst [vmem:[#allocation7 + $0x18] sm:$0xff] %v262_v6  ;;  %v183_v8 = vadd.f32 %v182_v7, %v83_v59  ;;  %v265_v9 = vpop.f32.mrb[2].mxu1  ;;  %v184_v10 = vpop.f32.mrb[3].mxu0 }
 0x114   :  { %v266_v11 = vadd.f32 %v265_v9, %v91_v60  ;;  %v185_v12 = vadd.f32 %v184_v10, %v87_v61  ;;  %v267_v13 = vpop.f32.mrb[3].mxu1 }
 0x115   :  { %280 = vst [vmem:[#allocation7 + $0x20] sm:$0xff] %v183_v8  ;;  %v268_v14 = vadd.f32 %v267_v13, %v95_v62 }
 0x116   :  { %282 = vst [vmem:[#allocation7 + $0x30] sm:$0xff] %v266_v11  ;;  %281 = vst [vmem:[#allocation7 + $0x28] sm:$0xff] %v185_v12  ;;  %v188_v15 = vpop.f32.mrb[4].mxu0 }
 0x117   :  { %283 = vst [vmem:[#allocation7 + $0x38] sm:$0xff] %v268_v14  ;;  %v189_v16 = vadd.f32 %v188_v15, %v83_v59  ;;  %v271_v17 = vpop.f32.mrb[4].mxu1  ;;  %v190_v18 = vpop.f32.mrb[5].mxu0 }
 0x118   :  { %v272_v19 = vadd.f32 %v271_v17, %v91_v60  ;;  %v191_v20 = vadd.f32 %v190_v18, %v87_v61  ;;  %v273_v21 = vpop.f32.mrb[5].mxu1 }
 0x119   :  { %284 = vst [vmem:[#allocation7 + $0x40] sm:$0xff] %v189_v16  ;;  %v274_v22 = vadd.f32 %v273_v21, %v95_v62 }
 0x11a   :  { %286 = vst [vmem:[#allocation7 + $0x50] sm:$0xff] %v272_v19  ;;  %285 = vst [vmem:[#allocation7 + $0x48] sm:$0xff] %v191_v20 }
 0x11b   :  { %287 = vst [vmem:[#allocation7 + $0x58] sm:$0xff] %v274_v22 }
 0x11c   :  { %407 = shalt.err (!%p404_p6)
}
 0x11d   :  { %s408_s17 = scalar_lea.hbm %s506_s3, 1536 }
 0x11e   :  { %p409_p7 = scmp.ne.s32.totalorder %s506_s3, %s408_s17  ;;  %p412_p8 = scmp.lt.u32.totalorder %s408_s17, %s506_s3 }
 0x120   :  { %p414_p9 = pnand %p412_p8, %p409_p7 }
 0x122   :  { %417 = shalt.err (!%p414_p9)
}
 0x123   :  { %299 = dma.vmem_to_hbm [thread:$0]  %s294_s13, 1536, %s506_s3, [#allocation4], %s428_s0, %s428_s0, %s429_s9  }
 0x124   :  { %422 = dma.done.wait [#allocation4], 1536  }
 0x125   :  { %423 = vsyncadd [#allocation4], 4294965760 }
 0x126   :  { %303 = vsyncpa [#allocation3], 1 }
 0x127   :  { %304 = vsyncpa [#allocation6], 1 }
 0x128   :  { %305 = vsyncpa [#allocation4], 1 }

</bundles_post_ra>
